<compile_context>
chip_gen: v6e
topology: v6e:2x2x1
jax: 0.10.0
libtpu: 0.0.40
codegen_flags: <defaults>
</compile_context>

<pallas_src>
import functools
import math

import jax
import jax.numpy as jnp
from jax.experimental import pallas as pl
from jax.experimental.pallas import tpu as pltpu


def _round_up(v, m):
    return (v + m - 1) // m * m


def _maxpool_same_kernel(x_ref, o_ref, *, kh, kw, sh, sw, ho, wo, c):
    # x_ref: (1, Hq, sh, Wq, sw*C)  zero-padded input; H split as (Hq, sh),
    #                               W split as (Wq, sw) with sw merged into lanes.
    # o_ref: (1, Ho, Wo, C)         pooled output tile.

    # Stage 1: reduce the kh vertical taps.  Padded row (out_h*sh + i) lives at
    # (Hq index out_h + i // sh, phase i % sh) -> unit-stride leading-dim slice.
    h_red = None
    for i in range(kh):
        q, r = divmod(i, sh)
        tap = x_ref[0, pl.ds(q, ho), r, :, :]            # (Ho, Wq, sw*C)
        h_red = tap if h_red is None else jnp.maximum(h_red, tap)

    # Stage 2: reduce the kw horizontal taps on the (smaller) H-reduced slab.
    # Padded column (out_w*sw + j) lives at (Wq index out_w + j // sw, phase
    # j % sw).  Group taps by phase so the width-C lane slice is done once per
    # phase (sw slices) instead of once per tap (kw slices).
    acc = None
    for r in range(sw):
        taps = [j for j in range(kw) if j % sw == r]
        if not taps:
            continue
        phase = h_red[:, :, r * c:(r + 1) * c]           # (Ho, Wq, C)
        for j in taps:
            q = j // sw
            tap = phase[:, q:q + wo, :]                  # (Ho, Wo, C)
            acc = tap if acc is None else jnp.maximum(acc, tap)

    o_ref[0] = acc.astype(o_ref.dtype)


@functools.partial(jax.jit, static_argnames=("kh", "kw", "sh", "sw"))
def _maxpool2d_same(x, *, kh, kw, sh, sw):
    # x: NCHW (PyTorch convention)
    n, c, h, w = x.shape

    # TF/Keras "same" padding, exactly as the PyTorch module computes it.
    extra_w = (math.ceil(w / sw) - 1) * sw - w + kw
    extra_h = (math.ceil(h / sh) - 1) * sh - h + kh
    left = extra_w // 2
    right = extra_w - left
    top = extra_h // 2
    bottom = extra_h - top

    hp = h + top + bottom
    wp = w + left + right
    ho = (hp - kh) // sh + 1
    wo = (wp - kw) // sw + 1

    # Alignment so padded extents factor as Hq*sh / Wq*sw.  The adjusted rows/cols
    # lie strictly past the last pooling window, so they are never selected.
    hq = ho + (kh - 1) // sh
    wq = wo + (kw - 1) // sw
    pad_b = hq * sh - hp
    pad_r = wq * sw - wp

    # NCHW -> NHWC and zero padding (value=0; negative amounts crop, like F.pad).
    x_nhwc = jnp.transpose(x, (0, 2, 3, 1))
    zero = jnp.array(0, dtype=x.dtype)
    x_pad = jax.lax.pad(
        x_nhwc, zero,
        ((0, 0, 0),
         (top, bottom + pad_b, 0),
         (left, right + pad_r, 0),
         (0, 0, 0)))

    # Free row-major reshape: (N, Hq*sh, Wq*sw, C) -> (N, Hq, sh, Wq, sw*C).
    x_split = x_pad.reshape(n, hq, sh, wq, sw * c)

    kernel = functools.partial(
        _maxpool_same_kernel, kh=kh, kw=kw, sh=sh, sw=sw, ho=ho, wo=wo, c=c)

    # Rough VMEM budget (double-buffered in/out blocks with (8,128) tile padding).
    itemsize = jnp.dtype(x.dtype).itemsize
    in_block = hq * sh * _round_up(wq, 8) * _round_up(sw * c, 128) * itemsize
    out_block = ho * _round_up(wo, 8) * _round_up(c, 128) * itemsize
    vmem_est = 2 * (in_block + out_block) + (4 << 20)

    params = dict(dimension_semantics=("parallel",))
    if vmem_est > (16 << 20):
        params["vmem_limit_bytes"] = min(vmem_est, 64 << 20)

    out_nhwc = pl.pallas_call(
        kernel,
        out_shape=jax.ShapeDtypeStruct((n, ho, wo, c), x.dtype),
        grid=(n,),
        in_specs=[pl.BlockSpec((1, hq, sh, wq, sw * c),
                               lambda i: (i, 0, 0, 0, 0))],
        out_specs=pl.BlockSpec((1, ho, wo, c), lambda i: (i, 0, 0, 0)),
        compiler_params=pltpu.CompilerParams(**params),
    )(x_split)

    # NHWC -> NCHW
    return jnp.transpose(out_nhwc, (0, 3, 1, 2))


class MaxPool2dStaticSamePadding:
    """JAX/Pallas equivalent of the PyTorch module (parameter-free)."""

    def __init__(self, kernel_size, stride=None, **kwargs):
        if stride is None:
            stride = kernel_size  # nn.MaxPool2d default: stride = kernel_size
        self.kernel_size = self._pair(kernel_size)
        self.stride = self._pair(stride)

    @staticmethod
    def _pair(v):
        if isinstance(v, int):
            return [v, v]
        v = list(v)
        if len(v) == 1:
            return [v[0], v[0]]
        return v

    def __call__(self, x):  # x: NCHW
        kh, kw = self.kernel_size
        sh, sw = self.stride
        return _maxpool2d_same(x, kh=kh, kw=kw, sh=sh, sw=sw)


def _reference(x, kernel_size, stride):
    """Pure-JAX reference mirroring the PyTorch forward exactly (NCHW)."""
    n, c, h, w = x.shape
    kh, kw = kernel_size
    sh, sw = stride
    extra_w = (math.ceil(w / sw) - 1) * sw - w + kw
    extra_h = (math.ceil(h / sh) - 1) * sh - h + kh
    left = extra_w // 2
    right = extra_w - left
    top = extra_h // 2
    bottom = extra_h - top
    zero = jnp.array(0, dtype=x.dtype)
    xp = jax.lax.pad(
        x, zero,
        ((0, 0, 0), (0, 0, 0), (top, bottom, 0), (left, right, 0)))
    return jax.lax.reduce_window(
        xp,
        jnp.array(-jnp.inf, dtype=x.dtype),
        jax.lax.max,
        window_dimensions=(1, 1, kh, kw),
        window_strides=(1, 1, sh, sw),
        padding="VALID")


if __name__ == "__main__":
    key = jax.random.PRNGKey(0)

    # Main BiFPN-style config: MaxPool2d(kernel_size=3, stride=2), NCHW input.
    x = jax.random.normal(key, (2, 4, 16, 16), dtype=jnp.float32)
    pool = MaxPool2dStaticSamePadding(3, 2)
    y = pool(x)
    jax.block_until_ready(y)
    y_ref = _reference(x, pool.kernel_size, pool.stride)
    assert y.shape == y_ref.shape == (2, 4, 8, 8), (y.shape, y_ref.shape)
    assert jnp.allclose(y, y_ref), "Pallas maxpool mismatch vs reference (k=3,s=2)"

    # Extra small configs to exercise odd spatial sizes and stride==kernel.
    x2 = jax.random.normal(jax.random.PRNGKey(0), (1, 8, 15, 15), dtype=jnp.float32)
    pool2 = MaxPool2dStaticSamePadding(2, 2)
    y2 = pool2(x2)
    jax.block_until_ready(y2)
    y2_ref = _reference(x2, pool2.kernel_size, pool2.stride)
    assert y2.shape == y2_ref.shape, (y2.shape, y2_ref.shape)
    assert jnp.allclose(y2, y2_ref), "Pallas maxpool mismatch vs reference (k=2,s=2)"

    pool3 = MaxPool2dStaticSamePadding(3, 1)
    y3 = pool3(x2)
    jax.block_until_ready(y3)
    y3_ref = _reference(x2, pool3.kernel_size, pool3.stride)
    assert y3.shape == y3_ref.shape, (y3.shape, y3_ref.shape)
    assert jnp.allclose(y3, y3_ref), "Pallas maxpool mismatch vs reference (k=3,s=1)"

    print("KERNEL_OK")
</pallas_src>

<mosaic_0001>
module attributes {stable_mosaic.version = 11 : i64} {
  func.func @_maxpool_same_kernel(%arg0: i32, %arg1: memref<1x9x2x9x8xf32, #tpu.memory_space<vmem>>, %arg2: memref<1x8x8x4xf32, #tpu.memory_space<vmem>>) attributes {dimension_semantics = [#tpu.dimension_semantics<parallel>], iteration_bounds = array<i64: 2>, scalar_prefetch = 0 : i64, scratch_operands = 0 : i64, tpu.core_type = #tpu.core_type<tc>, window_params = [{transform_indices = @transform_0, window_bounds = array<i64: 1, 9, 2, 9, 8>}, {transform_indices = @transform_1, window_bounds = array<i64: 1, 8, 8, 4>}]} {
    %c0 = arith.constant 0 : index
    %c0_0 = arith.constant 0 : index
    %c0_1 = arith.constant 0 : index
    %c0_2 = arith.constant 0 : index
    %c0_3 = arith.constant 0 : index
    %0 = vector.load %arg1[%c0, %c0_0, %c0_1, %c0_2, %c0_3] : memref<1x9x2x9x8xf32, #tpu.memory_space<vmem>>, vector<1x8x1x9x8xf32>
    %1 = vector.shape_cast %0 : vector<1x8x1x9x8xf32> to vector<8x9x8xf32>
    %c0_4 = arith.constant 0 : index
    %c0_5 = arith.constant 0 : index
    %c1 = arith.constant 1 : index
    %c0_6 = arith.constant 0 : index
    %c0_7 = arith.constant 0 : index
    %2 = vector.load %arg1[%c0_4, %c0_5, %c1, %c0_6, %c0_7] : memref<1x9x2x9x8xf32, #tpu.memory_space<vmem>>, vector<1x8x1x9x8xf32>
    %3 = vector.shape_cast %2 : vector<1x8x1x9x8xf32> to vector<8x9x8xf32>
    %4 = arith.maximumf %1, %3 : vector<8x9x8xf32>
    %c0_8 = arith.constant 0 : index
    %c1_9 = arith.constant 1 : index
    %c0_10 = arith.constant 0 : index
    %c0_11 = arith.constant 0 : index
    %c0_12 = arith.constant 0 : index
    %5 = vector.load %arg1[%c0_8, %c1_9, %c0_10, %c0_11, %c0_12] : memref<1x9x2x9x8xf32, #tpu.memory_space<vmem>>, vector<1x8x1x9x8xf32>
    %6 = vector.shape_cast %5 : vector<1x8x1x9x8xf32> to vector<8x9x8xf32>
    %7 = arith.maximumf %4, %6 : vector<8x9x8xf32>
    %8 = vector.extract_strided_slice %7 {offsets = [0, 0, 0], sizes = [8, 9, 4], strides = [1, 1, 1]} : vector<8x9x8xf32> to vector<8x9x4xf32>
    %9 = vector.extract_strided_slice %8 {offsets = [0, 0, 0], sizes = [8, 8, 4], strides = [1, 1, 1]} : vector<8x9x4xf32> to vector<8x8x4xf32>
    %10 = vector.extract_strided_slice %8 {offsets = [0, 1, 0], sizes = [8, 8, 4], strides = [1, 1, 1]} : vector<8x9x4xf32> to vector<8x8x4xf32>
    %11 = arith.maximumf %9, %10 : vector<8x8x4xf32>
    %12 = vector.extract_strided_slice %7 {offsets = [0, 0, 4], sizes = [8, 9, 4], strides = [1, 1, 1]} : vector<8x9x8xf32> to vector<8x9x4xf32>
    %13 = vector.extract_strided_slice %12 {offsets = [0, 0, 0], sizes = [8, 8, 4], strides = [1, 1, 1]} : vector<8x9x4xf32> to vector<8x8x4xf32>
    %14 = arith.maximumf %11, %13 : vector<8x8x4xf32>
    %c0_13 = arith.constant 0 : index
    %c0_14 = arith.constant 0 : index
    %c0_15 = arith.constant 0 : index
    %c0_16 = arith.constant 0 : index
    %15 = vector.load %arg2[%c0_13, %c0_14, %c0_15, %c0_16] : memref<1x8x8x4xf32, #tpu.memory_space<vmem>>, vector<1x8x8x4xf32>
    %16 = vector.shape_cast %15 : vector<1x8x8x4xf32> to vector<8x8x4xf32>
    %17 = vector.shape_cast %14 : vector<8x8x4xf32> to vector<1x8x8x4xf32>
    tpu.vector_store %arg2[%c0_13, %c0_14, %c0_15, %c0_16], %17 {strides = array<i32>} : memref<1x8x8x4xf32, #tpu.memory_space<vmem>>, vector<1x8x8x4xf32>,
    return
  }
  func.func @transform_0(%arg0: i32) -> (i32, i32, i32, i32, i32) {
    %c0_i32 = arith.constant 0 : i32
    %c0_i32_0 = arith.constant 0 : i32
    %c0_i32_1 = arith.constant 0 : i32
    %c0_i32_2 = arith.constant 0 : i32
    %c0_i32_3 = arith.constant 0 : i32
    return %arg0, %c0_i32, %c0_i32_0, %c0_i32_1, %c0_i32_2 : i32, i32, i32, i32, i32
  }
  func.func @transform_1(%arg0: i32) -> (i32, i32, i32, i32) {
    %c0_i32 = arith.constant 0 : i32
    %c0_i32_0 = arith.constant 0 : i32
    %c0_i32_1 = arith.constant 0 : i32
    %c0_i32_2 = arith.constant 0 : i32
    return %arg0, %c0_i32, %c0_i32_0, %c0_i32_1 : i32, i32, i32, i32
  }
}

</mosaic_0001>

<bundles_post_ra>
// kernel: _maxpool2d_same.1
= control target key start
LH: loop header
LB: loop body
LE: loop exit
PB: predicated region body
PF: predicated region fallthrough
CT: control target
= control target key end

     0   :  { %s424_s6 = smov 0   ;;  %s552_s0 = inlined_call_operand.vmem [shape: f32[2,9,2,9,8], index: 0, kind: input, shape index: {}]   ;;  %s553_s1 = inlined_call_operand.vmem [shape: f32[2,8,8,4], index: 1, kind: output, shape index: {}]  }
   0x1 LB: > { %s352_s7 = sadd.s32 4294967295, %s411_s6   ;;  %p356_p0 = scmp.ge.s32.totalorder %s411_s6, 1  ;;  %s411_s6 = sphi %s424_s6, %s11_s6  }
   0x2   : > { %p87_p1 = scmp.lt.s32.totalorder %s411_s6, 3 }
   0x4   : > { %p88_p2 = pnand %p356_p0, %p87_p1 }
   0x5   : > { %p107_p3 = scmp.lt.s32.totalorder (!%p88_p2), %s352_s7, 1  ;;  %s413_s12 = smov (!%p88_p2), 124  }
   0x6   : > { %91 = sbr.rel (%p88_p2) target bundleno = 152 (0x98), region = 24 }
   0xb   : > { %s555_s7 = smov (!%p107_p3, %s352_s7), 1  ;;  %vm215_vm0 = vcmask 1046528   ;;  %vm288_vm1 = vcmask 31744  }
   0xc   : > { %s395_s8 = smul.u32 288, %s555_s7  ;;  %s394_s13 = sshll.u32 %s555_s7, 6 }
   0xd   : > { %s116_s16 = scalar_lea.vmem %s553_s1, %s394_s13 }
   0xe   : > { %s438_s11 = scalar_lea.vmem %s552_s0, %s395_s8 }
   0xf   : > { %v121_v0 = vld [vmem:[%s438_s11 + $0x40] sm:$0xff]  ;;  %v364_v1 = vld [vmem:[%s438_s11 + $0x50] sm:$0xff]  ;;  %v122_v26 = vld [vmem:[%s438_s11 + $0x48] sm:$0x1] }
  0x10   : > { %v380_v2 = vld [vmem:[%s438_s11 + $0x60] sm:$0xff]  ;;  %v154_v3 = vmax.f32 %v121_v0, %v364_v1  ;;  %v360_v5 = vld [vmem:[%s438_s11 + $0x10] sm:$0xff]  ;;  %v365_v29 = vld [vmem:[%s438_s11 + $0x58] sm:$0x1] }
  0x11   : > { %v117_v4 = vld [vmem:[%s438_s11] sm:$0xff]  ;;  %v366_v8 = vld [vmem:[%s438_s11 + $0x70] sm:$0xff]  ;;  %v381_v30 = vld [vmem:[%s438_s11 + $0x68] sm:$0x1]  ;;  %v155_v33 = vmax.f32 %v122_v26, %v365_v29 }
  0x12   : > { %v376_v6 = vld [vmem:[%s438_s11 + $0x20] sm:$0xff]  ;;  %v150_v7 = vmax.f32 %v117_v4, %v360_v5  ;;  %v362_v10 = vld [vmem:[%s438_s11 + $0x30] sm:$0xff]  ;;  %v449_v11 = vmax.f32 %v154_v3, %v380_v2  ;;  %v156_v12 = vmax.f32 %v380_v2, %v366_v8  ;;  %v118_v34 = vld [vmem:[%s438_s11 + $0x8] sm:$0x1] }
  0x13   : > { %v382_v9 = vld [vmem:[%s438_s11 + $0x80] sm:$0xff]  ;;  %v152_v13 = vmax.f32 %v376_v6, %v362_v10  ;;  %v370_v15 = vld [vmem:[%s438_s11 + $0xb0] sm:$0xff]  ;;  %v361_v35 = vld [vmem:[%s438_s11 + $0x18] sm:$0x1]  ;;  %v188_v43 = vmax.f32 %v155_v33, %v381_v30 }
  0x14   : > { %v127_v14 = vld [vmem:[%s438_s11 + $0xa0] sm:$0xff]  ;;  %v454_v17 = vmax.f32 %v150_v7, %v376_v6  ;;  %v368_v19 = vld [vmem:[%s438_s11 + $0x90] sm:$0xff]  ;;  %260 = vrot.lane.b32.xlu1 %v449_v11, %s413_s12  ;;  %v461_v22 = vmax.f32 %v156_v12, %v382_v9  ;;  %v222_v31 = vrot.slane %v449_v11, 1  ;;  %v377_v36 = vld [vmem:[%s438_s11 + $0x28] sm:$0x1]  ;;  %v151_v39 = vmax.f32 %v118_v34, %v361_v35 }
  0x15   : > { %v386_v16 = vld [vmem:[%s438_s11 + $0xc0] sm:$0xff]  ;;  %v160_v18 = vmax.f32 %v127_v14, %v370_v15  ;;  %v374_v21 = vld [vmem:[%s438_s11 + $0xf0] sm:$0xff]  ;;  %v463_v23 = vmax.f32 %v152_v13, %v121_v0  ;;  %v158_v27 = vmax.f32 %v382_v9, %v368_v19  ;;  %v124_v40 = vld [vmem:[%s438_s11 + $0x68] sm:$0x1]  ;;  %v223_v56 = vrot.slane %v188_v43, 1 }
  0x16   : > { %v131_v20 = vld [vmem:[%s438_s11 + $0xe0] sm:$0xff]  ;;  %v372_v25 = vld [vmem:[%s438_s11 + $0xd0] sm:$0xff]  ;;  %256 = vrot.lane.b32.xlu0 %v454_v17, %s413_s12  ;;  %v216_v32 = vrot.slane %v454_v17, 1  ;;  %v367_v41 = vld [vmem:[%s438_s11 + $0x78] sm:$0x1]  ;;  %v225_v45 = vrot.slane %v461_v22, 1  ;;  %v184_v51 = vmax.f32 %v151_v39, %v377_v36 }
  0x17   : > { %v390_v24 = vld [vmem:[%s438_s11 + $0x100] sm:$0xff]  ;;  %v164_v28 = vmax.f32 %v131_v20, %v374_v21  ;;  %v477_v37 = vmax.f32 %v160_v18, %v386_v16  ;;  %v162_v38 = vmax.f32 %v386_v16, %v372_v25  ;;  %v383_v42 = vld [vmem:[%s438_s11 + $0x88] sm:$0x1]  ;;  %v157_v44 = vmax.f32 %v124_v40, %v367_v41  ;;  %v363_v47 = vld [vmem:[%s438_s11 + $0x38] sm:$0x1] }
  0x18   : > { %262 = vrot.lane.b32.xlu1 %v461_v22, %s413_s12  ;;  %v120_v46 = vld [vmem:[%s438_s11 + $0x28] sm:$0x1]  ;;  %v219_v48 = vrot.slane %v463_v23, 1  ;;  %v490_v49 = vmax.f32 %v158_v27, %v127_v14  ;;  %v371_v55 = vld [vmem:[%s438_s11 + $0xb8] sm:$0x1]  ;;  %v217_v63 = vrot.slane %v184_v51, 1  ;;  %v224_v4 = vsel %vm215_vm0, %v222_v31, %v223_v56 }
  0x19   : > { %v492_v50 = vmax.f32 %v164_v28, %v390_v24  ;;  %v153_v52 = vmax.f32 %v120_v46, %v363_v47  ;;  %v379_v53 = vld [vmem:[%s438_s11 + $0x48] sm:$0x1]  ;;  %v190_v57 = vmax.f32 %v157_v44, %v383_v42  ;;  %v231_v60 = vrot.slane %v477_v37, 1  ;;  %v369_v1 = vld [vmem:[%s438_s11 + $0x98] sm:$0x1] }
  0x1a   : > { %258 = vrot.lane.b32.xlu0 %v463_v23, %s413_s12  ;;  %v128_v54 = vld [vmem:[%s438_s11 + $0xa8] sm:$0x1]  ;;  %v500_v62 = vmax.f32 %v162_v38, %v131_v20  ;;  %v228_v3 = vrot.slane %v490_v49, 1  ;;  %v375_v9 = vld [vmem:[%s438_s11 + $0xf8] sm:$0x1]  ;;  %v250_v10 = vmax.f32 %v449_v11, %v224_v4  ;;  %v218_v12 = vsel %vm215_vm0, %v216_v32, %v217_v63 }
  0x1b   : > { %v161_v58 = vmax.f32 %v128_v54, %v371_v55  ;;  %v387_v59 = vld [vmem:[%s438_s11 + $0xc8] sm:$0x1]  ;;  %v186_v0 = vmax.f32 %v153_v52, %v379_v53  ;;  %v226_v5 = vrot.slane %v190_v57, 1  ;;  %v248_v18 = vmax.f32 %v454_v17, %v218_v12  ;;  %v373_v24 = vld [vmem:[%s438_s11 + $0xd8] sm:$0x1] }
  0x1c   : > { %v126_v61 = vld [vmem:[%s438_s11 + $0x88] sm:$0x1]  ;;  %266 = vrot.lane.b32.xlu1 %v477_v37, %s413_s12  ;;  %v237_v11 = vrot.slane %v492_v50, 1  ;;  %v234_v35 = vrot.slane %v500_v62, 1 }
  0x1d   : > { %v385_v2 = vld [vmem:[%s438_s11 + $0xa8] sm:$0x1]  ;;  %v194_v6 = vmax.f32 %v161_v58, %v387_v59  ;;  %v159_v7 = vmax.f32 %v126_v61, %v369_v1  ;;  %v220_v13 = vrot.slane %v186_v0, 1  ;;  %v227_v19 = vsel %vm215_vm0, %v225_v45, %v226_v5 }
  0x1e   : > { %v132_v8 = vld [vmem:[%s438_s11 + $0xe8] sm:$0x1]  ;;  %264 = vrot.lane.b32.xlu0 %v490_v49, %s413_s12  ;;  %v251_v25 = vmax.f32 %v461_v22, %v227_v19 }
  0x1f   : > { %v165_v14 = vmax.f32 %v132_v8, %v375_v9  ;;  %v391_v15 = vld [vmem:[%s438_s11 + $0x108] sm:$0x1]  ;;  %v232_v20 = vrot.slane %v194_v6, 1  ;;  %v192_v21 = vmax.f32 %v159_v7, %v385_v2  ;;  %v221_v26 = vsel %vm215_vm0, %v219_v48, %v220_v13 }
  0x20   : > { %v130_v16 = vld [vmem:[%s438_s11 + $0xc8] sm:$0x1]  ;;  %270 = vrot.lane.b32.xlu1 %v492_v50, %s413_s12  ;;  %v249_v29 = vmax.f32 %v463_v23, %v221_v26 }
  0x21   : > { %v198_v27 = vmax.f32 %v165_v14, %v391_v15  ;;  %v389_v28 = vld [vmem:[%s438_s11 + $0xe8] sm:$0x1]  ;;  %v233_v17 = vsel %vm215_vm0, %v231_v60, %v232_v20  ;;  %v229_v30 = vrot.slane %v192_v21, 1  ;;  %v163_v31 = vmax.f32 %v130_v16, %v373_v24 }
  0x22   : > { %268 = vrot.lane.b32.xlu0 %v500_v62, %s413_s12  ;;  %v253_v22 = vmax.f32 %v477_v37, %v233_v17 }
  0x23   : > { %v238_v32 = vrot.slane %v198_v27, 1  ;;  %v230_v33 = vsel %vm215_vm0, %v228_v3, %v229_v30  ;;  %v196_v34 = vmax.f32 %v163_v31, %v389_v28 }
  0x24   : > { %v252_v36 = vmax.f32 %v490_v49, %v230_v33 }
  0x25   : > { %v239_v23 = vsel %vm215_vm0, %v237_v11, %v238_v32  ;;  %v235_v39 = vrot.slane %v196_v34, 1 }
  0x26   : > { %v255_v38 = vmax.f32 %v492_v50, %v239_v23 }
  0x27   : > { %v236_v40 = vsel %vm215_vm0, %v234_v35, %v235_v39 }
  0x28   : > { %v254_v41 = vmax.f32 %v500_v62, %v236_v40 }
  0x86   : > { %v261_v37 = vpop.permute.xlu1 %260 }
  0x87   : > { %v282_v42 = vmax.f32 %v250_v10, %v261_v37 }
  0x88   : > { %v257_v43 = vpop.permute.xlu0 %256 }
  0x89   : > { %v280_v44 = vmax.f32 %v248_v18, %v257_v43  ;;  %291 = vst.msk [vmem:[%s116_s16 + $0x10] sm:$0xff] %vm288_vm1, %v282_v42 }
  0x8a   : > { %v263_v45 = vpop.permute.xlu1 %262 }
  0x8b   : > { %289 = vst.msk [vmem:[%s116_s16] sm:$0xff] %vm288_vm1, %v280_v44  ;;  %v283_v46 = vmax.f32 %v251_v25, %v263_v45 }
  0x8c   : > { %v259_v47 = vpop.permute.xlu0 %258 }
  0x8d   : > { %v281_v48 = vmax.f32 %v249_v29, %v259_v47  ;;  %292 = vst.msk [vmem:[%s116_s16 + $0x18] sm:$0xff] %vm288_vm1, %v283_v46 }
  0x8e   : > { %v267_v49 = vpop.permute.xlu1 %266 }
  0x8f   : > { %290 = vst.msk [vmem:[%s116_s16 + $0x8] sm:$0xff] %vm288_vm1, %v281_v48  ;;  %v285_v50 = vmax.f32 %v253_v22, %v267_v49 }
  0x90   : > { %v265_v51 = vpop.permute.xlu0 %264 }
  0x91   : > { %v284_v52 = vmax.f32 %v252_v36, %v265_v51  ;;  %294 = vst.msk [vmem:[%s116_s16 + $0x28] sm:$0xff] %vm288_vm1, %v285_v50 }
  0x92   : > { %v271_v53 = vpop.permute.xlu1 %270 }
  0x93   : > { %293 = vst.msk [vmem:[%s116_s16 + $0x20] sm:$0xff] %vm288_vm1, %v284_v52  ;;  %v287_v54 = vmax.f32 %v255_v38, %v271_v53 }
  0x94   : > { %v269_v55 = vpop.permute.xlu0 %268 }
  0x95   : > { %v286_v56 = vmax.f32 %v254_v41, %v269_v55  ;;  %296 = vst.msk [vmem:[%s116_s16 + $0x38] sm:$0xff] %vm288_vm1, %v287_v54 }
  0x97   : > { %295 = vst.msk [vmem:[%s116_s16 + $0x30] sm:$0xff] %vm288_vm1, %v286_v56 }
  0x98 PF: > { %s11_s6 = sadd.s32 1, %s411_s6  }
  0x99   : > { %p8_p4 = scmp.ge.s32.totalorder %s11_s6, 4  }
  0x9b   :  { %10 = sbr.rel (!%p8_p4) target bundleno = 1 (0x1), region = 56 }

</bundles_post_ra>
